<compile_context>
chip_gen: v7x
topology: tpu7x:2x2x1
jax: 0.10.0
libtpu: 0.0.40
codegen_flags: <defaults>
</compile_context>

<pallas_src>
import numpy as np
import jax
import jax.numpy as jnp
from jax import lax
from jax.experimental import pallas as pl
from jax.experimental.pallas import tpu as pltpu


def _round_up(x, m):
    return ((x + m - 1) // m) * m


# --------------------------------------------------------------------------
# Pallas kernel 1: fused multi-head 2-layer MLP (grid over heads)
# --------------------------------------------------------------------------

def _fused_mlp2_kernel(x_ref, w1_ref, b1_ref, w2_ref, b2_ref, o_ref):
    # One head per grid step: out = relu(x @ W1 + b1) @ W2 + b2 (both on MXU).
    # NOTE: for production contraction sizes (emb_dim >= 256) cast the dot
    # operands to bfloat16 (keep preferred_element_type=f32) on v5e/v6e.
    x = x_ref[0]
    h = jnp.dot(x, w1_ref[0], preferred_element_type=jnp.float32) + b1_ref[0]
    h = jnp.maximum(h, 0.0)
    o = jnp.dot(h, w2_ref[0], preferred_element_type=jnp.float32) + b2_ref[0]
    o_ref[0] = o.astype(o_ref.dtype)


def fused_mlp2_heads(xs, w1_stack, b1_stack, w2_stack, b2_stack, head_out_dims):
    """Run H independent 2-layer MLP heads in ONE pallas_call.

    xs          : list of H inputs (M_h, D) — no (8,128) padding needed, the
                  per-head block covers the full last two dims.
    w1_stack    : (H, D, D)      b1_stack: (H, 1, D)
    w2_stack    : (H, D, Op)     b2_stack: (H, 1, Op)   Op = multiple of 128
                  so the output store is lane-dense (no masked vst).
    Returns list of H float32 outputs (M_h, O_h).
    """
    H, D, Op = w2_stack.shape
    Ms = [int(x.shape[0]) for x in xs]
    Mmax = max(Ms)
    # Stack inputs into one slab (rows zero-padded only for stacking; padded
    # rows are sliced off below).
    X = jnp.zeros((H, Mmax, D), jnp.float32)
    for h, x in enumerate(xs):
        X = X.at[h, :Ms[h], :].set(x.astype(jnp.float32))

    out = pl.pallas_call(
        _fused_mlp2_kernel,
        out_shape=jax.ShapeDtypeStruct((H, Mmax, Op), jnp.float32),
        grid=(H,),
        in_specs=[
            pl.BlockSpec((1, Mmax, D), lambda h: (h, 0, 0)),
            pl.BlockSpec((1, D, D), lambda h: (h, 0, 0)),
            pl.BlockSpec((1, 1, D), lambda h: (h, 0, 0)),
            pl.BlockSpec((1, D, Op), lambda h: (h, 0, 0)),
            pl.BlockSpec((1, 1, Op), lambda h: (h, 0, 0)),
        ],
        out_specs=pl.BlockSpec((1, Mmax, Op), lambda h: (h, 0, 0)),
        compiler_params=pltpu.CompilerParams(
            dimension_semantics=("parallel",),   # heads independent -> 2 TCs on v7x
            vmem_limit_bytes=32 * 1024 * 1024),
    )(X, w1_stack, b1_stack, w2_stack, b2_stack)

    return [out[h, :Ms[h], :head_out_dims[h]] for h in range(H)]


# --------------------------------------------------------------------------
# Pallas kernel 2: tiled L2-normalize + pairwise cosine distance
# --------------------------------------------------------------------------

def _cosdist_tile_kernel(hr_ref, hc_ref, d_ref):
    hr = hr_ref[...].astype(jnp.float32)
    hc = hc_ref[...].astype(jnp.float32)
    # F.normalize(eps=1e-12): x / max(||x||, 1e-12) == x * rsqrt(max(||x||^2, 1e-24))
    inv_r = lax.rsqrt(jnp.maximum(jnp.sum(hr * hr, axis=-1, keepdims=True), 1e-24))
    inv_c = lax.rsqrt(jnp.maximum(jnp.sum(hc * hc, axis=-1, keepdims=True), 1e-24))
    hr = hr * inv_r
    hc = hc * inv_c
    # Contract the feature dim of BOTH operands on the MXU — no explicit
    # transpose (no XLU / VMEM copy).
    sim = lax.dot_general(hr, hc,
                          dimension_numbers=(((1,), (1,)), ((), ())),
                          preferred_element_type=jnp.float32)
    d_ref[...] = 1.0 - sim


def pairwise_cosdist(h, tile=512):
    """dmat[i, j] = 1 - <h_i/||h_i||, h_j/||h_j||>  via a 2-D tiled grid.

    tile=512 (fp32) keeps each grid step well under the 32 MiB scoped default
    and v7x's 64 MiB physical VMEM; v5e/v6e could take larger tiles but 512 is
    safe on every generation.
    """
    N, D = h.shape
    h = h.astype(jnp.float32)
    tN = min(tile, _round_up(N, 8))
    Np = _round_up(N, tN)
    if Np != N:
        # Padded rows have norm 0 -> normalized to 0 -> distance 1; they are
        # sliced off below, so the mask survives the tiling.
        h = jnp.pad(h, ((0, Np - N), (0, 0)))
    grid = (Np // tN, Np // tN)
    dmat = pl.pallas_call(
        _cosdist_tile_kernel,
        out_shape=jax.ShapeDtypeStruct((Np, Np), jnp.float32),
        grid=grid,
        in_specs=[pl.BlockSpec((tN, D), lambda i, j: (i, 0)),
                  pl.BlockSpec((tN, D), lambda i, j: (j, 0))],
        out_specs=pl.BlockSpec((tN, tN), lambda i, j: (i, j)),
        compiler_params=pltpu.CompilerParams(
            dimension_semantics=("parallel", "parallel"),
            vmem_limit_bytes=32 * 1024 * 1024),
    )(h, h)
    return dmat[:N, :N]


# --------------------------------------------------------------------------
# Loss glue (plain JAX; small scalar reductions)
# --------------------------------------------------------------------------

def smooth_l1(pred, target):
    d = pred - target
    ad = jnp.abs(d)
    return jnp.mean(jnp.where(ad < 1.0, 0.5 * d * d, ad - 0.5))


def smooth_l1_masked(pred, target, mask):
    d = pred - jnp.where(mask, target, 0.0)
    ad = jnp.abs(d)
    v = jnp.where(ad < 1.0, 0.5 * d * d, ad - 0.5)
    v = jnp.where(mask, v, 0.0)
    return jnp.sum(v) / jnp.maximum(jnp.sum(mask), 1)


def masked_cross_entropy(logits, labels):
    # matches: F.cross_entropy(..., reduction='none')[labels != 0].mean()
    logz = jax.nn.logsumexp(logits, axis=-1)
    picked = jnp.take_along_axis(logits, labels[:, None], axis=-1)[:, 0]
    ce = logz - picked
    mask = labels != 0
    return jnp.sum(jnp.where(mask, ce, 0.0)) / jnp.maximum(jnp.sum(mask), 1)


def bce_with_logits(logits, targets):
    return jnp.mean(jnp.maximum(logits, 0.0) - logits * targets
                    + jnp.log1p(jnp.exp(-jnp.abs(logits))))


def margin_loss_fn(dmat, B, C, margin_factor, margin):
    # dmat: (B*C, B*C) cosine distances of the normalized reps.
    anchor_idx = np.arange(B) * C
    pos_cols = anchor_idx[:, None] + np.arange(1, C)[None, :]
    pos_sim = dmat[anchor_idx[:, None], pos_cols]                   # (B, C-1)
    sim_anchor = dmat[anchor_idx[:, None], anchor_idx[None, :]]     # (B, B)
    offdiag_cols = np.array([[j for j in range(B) if j != i] for i in range(B)])
    rows = np.arange(B)[:, None]
    sim_matrix = sim_anchor[rows, offdiag_cols]                     # (B, B-1)
    mf = margin_factor[rows, offdiag_cols]                          # (B, B-1)
    edge = jnp.where(mf == 0, 0.0, 1.0)[:, :, None]                 # (B, B-1, 1)
    marg = mf[:, :, None] * margin                                  # (B, B-1, 1)
    pos_b = pos_sim[:, None, :]                                     # (B, 1, C-1)
    neg_b = sim_matrix[:, :, None]                                  # (B, B-1, 1)
    return jnp.mean(jnp.maximum(0.0, edge * (marg + pos_b - neg_b)))


def adaptive_margin_loss_fn(dmat, B, C, dist, margin, coeff):
    m_loss = margin_loss_fn(dmat, B, C, dist, margin)
    anchor_idx = jnp.arange(B) * C
    # diff[a, p, n] = dist[a, n] - dist[a, p]
    diff = dist[:, None, :] - dist[:, :, None]
    a_g, p_g, n_g = jnp.meshgrid(jnp.arange(B), jnp.arange(B), jnp.arange(B),
                                 indexing='ij')
    valid = (diff > 0.3) & (a_g != p_g) & (a_g != n_g)
    flat_diff = jnp.where(valid, diff, -jnp.inf).reshape(-1)
    k = B * B                       # PyTorch keeps top batch_size**2 triplets
    topv, topi = lax.top_k(flat_diff, k)
    a_t = topi // (B * B)
    p_t = (topi // B) % B
    n_t = topi % B
    d_ap = dmat[anchor_idx[a_t], anchor_idx[p_t]]
    d_an = dmat[anchor_idx[a_t], anchor_idx[n_t]]
    valid_top = jnp.isfinite(topv)
    vals = jnp.where(valid_top, jnp.maximum(0.0, topv * margin + d_ap - d_an), 0.0)
    cnt = jnp.sum(valid_top)
    adaptive = jnp.sum(vals) / jnp.maximum(cnt, 1)
    return jnp.where(cnt > 0, coeff * adaptive + m_loss, m_loss)


# --------------------------------------------------------------------------
# GNNWrapper equivalent (compute_loss path)
# --------------------------------------------------------------------------

class GNNWrapperPallas:
    def __init__(self, params, *, emb_dim, num_candidates, margin,
                 adamg_coeff, knowledge_guided):
        self.emb_dim = emb_dim
        self.num_candidates = num_candidates
        self.margin = margin
        self.adamg_coeff = adamg_coeff
        self.knowledge_guided = knowledge_guided

        # Stack all MLP-head weights ONCE (head order: ctx, motif[, md, fp]).
        heads = [('ctx_w1', 'ctx_b1', 'ctx_w2', 'ctx_b2'),
                 ('motif_w1', 'motif_b1', 'motif_w2', 'motif_b2')]
        if knowledge_guided:
            heads += [('md_w1', 'md_b1', 'md_w2', 'md_b2'),
                      ('fp_w1', 'fp_b1', 'fp_w2', 'fp_b2')]
        H = len(heads)
        D = emb_dim
        self.head_out_dims = [int(params[h[2]].shape[1]) for h in heads]
        Op = _round_up(max(self.head_out_dims), 128)   # lane-dense output slab
        W1 = jnp.zeros((H, D, D), jnp.float32)
        B1 = jnp.zeros((H, 1, D), jnp.float32)
        W2 = jnp.zeros((H, D, Op), jnp.float32)
        B2 = jnp.zeros((H, 1, Op), jnp.float32)
        for h, (w1n, b1n, w2n, b2n) in enumerate(heads):
            O = self.head_out_dims[h]
            W1 = W1.at[h].set(params[w1n].astype(jnp.float32))
            B1 = B1.at[h, 0].set(params[b1n].astype(jnp.float32))
            W2 = W2.at[h, :, :O].set(params[w2n].astype(jnp.float32))
            B2 = B2.at[h, 0, :O].set(params[b2n].astype(jnp.float32))
        self.W1, self.B1, self.W2, self.B2 = W1, B1, W2, B2

    def compute_loss(self, graph_rep, batch):
        B = batch['batch_size']
        C = self.num_candidates
        D = self.emb_dim

        # ---------- loss_1 (mol similarity adaptive margin loss) ----------
        dmat0 = pairwise_cosdist(graph_rep[0][0])                 # Pallas kernel
        loss_1 = adaptive_margin_loss_fn(dmat0, B, C, batch['mol_dist'],
                                         self.margin, self.adamg_coeff)

        # loss_1_reg
        aggr0 = graph_rep[0][2].reshape(B, C, -1)
        K0 = aggr0.shape[-1]
        pos_cnt = jnp.sum(aggr0 > 0, axis=-1, keepdims=True)
        regu0 = jnp.where(aggr0 == 0, 0.0, 1.0 / jnp.maximum(pos_cnt, 1))
        loss_1_reg = smooth_l1(aggr0.reshape(-1, K0), regu0.reshape(-1, K0))

        # ---------- loss_2 (scaffold similarity adaptive margin loss) ----------
        dmat1 = pairwise_cosdist(graph_rep[1][0])                 # Pallas kernel
        loss_2 = adaptive_margin_loss_fn(dmat1, B, C, batch['scaff_dist'],
                                         self.margin, self.adamg_coeff)

        # loss_2_reg (regu targets from batch.regu_inds, built host-side)
        aggr1 = jnp.squeeze(graph_rep[1][2], axis=1)              # (B*C, K)
        loss_2_reg = smooth_l1(aggr1, batch['aggr2_regu'])

        # ---------- fused MLP heads: build all inputs, ONE pallas_call ----------
        L = batch['context_labels'].shape[1]
        h_tk = graph_rep[2][1].reshape(B, 2, -1, D)[:, -1]        # (B, Ntok, D)
        h_ctx = h_tk[:, :L].reshape(-1, D)                        # (B*L, D)
        h_motif = graph_rep[2][0].reshape(B, 2, D)[:, 0]          # (B, D)
        xs = [h_ctx, h_motif]

        if self.knowledge_guided:
            graph_value = jnp.stack(
                [graph_rep[i][0].reshape(B, -1, D)[:, 0] for i in range(3)],
                axis=1)                                           # (B, 3, D)
            gr1 = jnp.einsum('bkd,k->bd', graph_value,
                             jnp.array([0.45, 0.1, 0.45], jnp.float32))
            gr3 = jnp.einsum('bkd,k->bd', graph_value,
                             jnp.array([0.3, 0.1, 0.6], jnp.float32))
            # NOTE: the PyTorch code also computes scaff_md_scores/scaff_md_loss
            # from graph_rep_2 but never uses them in the returned losses
            # (dead code) — elided here.
            xs += [gr1, gr3]

        head_outs = fused_mlp2_heads(xs, self.W1, self.B1, self.W2, self.B2,
                                     self.head_out_dims)          # 1 Pallas call

        # ---------- loss_3 (context prediction + motif prediction) ----------
        context_logits = head_outs[0]                             # (B*L, ACS)
        context_loss = masked_cross_entropy(context_logits,
                                            batch['context_labels'].reshape(-1))
        motif_scores = head_outs[1]                               # (B, 86)
        motif_loss = smooth_l1(motif_scores, batch['motif_labels'])
        loss_3 = (context_loss + motif_loss) / 2.0

        losses = {'loss_1': loss_1, 'loss_2': loss_2, 'loss_3': loss_3,
                  'loss_1_reg': loss_1_reg, 'loss_2_reg': loss_2_reg}

        # ---------- loss_4 (knowledge guided) ----------
        if self.knowledge_guided:
            md_scores = head_outs[2]                              # (B, 114)
            mol_mds = batch['mol_mds']
            md_loss = smooth_l1_masked(md_scores, mol_mds, ~jnp.isnan(mol_mds))
            fp_scores = head_outs[3]                              # (B, 512)
            fp_loss = bce_with_logits(fp_scores.reshape(-1),
                                      batch['mol_fps'].reshape(-1))
            losses['loss_4'] = md_loss + fp_loss

        return losses

    def forward(self, graph_rep, batch):
        out = self.compute_loss(graph_rep, batch)
        out['graph_rep'] = graph_rep
        return out


# --------------------------------------------------------------------------
# Demo
# --------------------------------------------------------------------------

if __name__ == "__main__":
    key = jax.random.PRNGKey(0)
    B, C, D = 2, 3, 32            # batch_size, num_candidates, emb_dim
    ACS = 16                      # atom_context_size
    NTOK = 8                      # padded node/token count
    L = 5                         # context-label length
    margin = 1.0
    adamg_coeff = 0.1

    def nrm(k, shape, scale=0.05):
        return scale * jax.random.normal(k, shape, jnp.float32)

    ks = jax.random.split(key, 32)

    # ---- deterministic parameters (Linear stored as (in, out)) ----
    params = {
        'ctx_w1':   nrm(ks[0], (D, D)),    'ctx_b1':   nrm(ks[1], (D,)),
        'ctx_w2':   nrm(ks[2], (D, ACS)),  'ctx_b2':   nrm(ks[3], (ACS,)),
        'motif_w1': nrm(ks[4], (D, D)),    'motif_b1': nrm(ks[5], (D,)),
        'motif_w2': nrm(ks[6], (D, 86)),   'motif_b2': nrm(ks[7], (86,)),
        'md_w1':    nrm(ks[8], (D, D)),    'md_b1':    nrm(ks[9], (D,)),
        'md_w2':    nrm(ks[10], (D, 114)), 'md_b2':    nrm(ks[11], (114,)),
        'fp_w1':    nrm(ks[12], (D, D)),   'fp_b1':    nrm(ks[13], (D,)),
        'fp_w2':    nrm(ks[14], (D, 512)), 'fp_b2':    nrm(ks[15], (512,)),
    }

    # ---- synthetic graph_rep (outputs of gnn + PromptAggr) ----
    h_gr0 = jax.random.normal(ks[16], (B * C, D), jnp.float32)
    h_tk0 = jax.random.normal(ks[17], (B * C, NTOK, D), jnp.float32)
    score0 = jax.random.uniform(ks[18], (B * C, NTOK), jnp.float32)
    score0 = score0.at[:, -2:].set(0.0)          # padded tokens -> zero score

    h_gr1 = jax.random.normal(ks[19], (B * C, D), jnp.float32)
    h_tk1 = jax.random.normal(ks[20], (B * C, NTOK, D), jnp.float32)
    score1 = jax.random.uniform(ks[21], (B * C, 1, NTOK), jnp.float32)
    score1 = score1.at[:, :, -2:].set(0.0)

    h_gr2 = jax.random.normal(ks[22], (B * 2, D), jnp.float32)
    h_tk2 = jax.random.normal(ks[23], (B * 2, NTOK, D), jnp.float32)
    score2 = jax.random.uniform(ks[24], (B * 2, NTOK), jnp.float32)

    graph_rep = [(h_gr0, h_tk0, score0),
                 (h_gr1, h_tk1, score1),
                 (h_gr2, h_tk2, score2)]

    # ---- synthetic batch data ----
    r0 = jax.random.uniform(ks[25], (B, B), jnp.float32)
    mol_dist = (r0 + r0.T) * 0.5 * (1.0 - jnp.eye(B))
    r1 = jax.random.uniform(ks[26], (B, B), jnp.float32)
    scaff_dist = (r1 + r1.T) * 0.5 * (1.0 - jnp.eye(B))

    regu_np = np.zeros((B * C, NTOK), np.float32)   # stand-in for regu_inds scatter
    fixed_inds = [[0, 1], [2], [], [1, 3, 5], [0], [4, 6]]
    for i, inds in enumerate(fixed_inds):
        if inds:
            regu_np[i, inds] = 1.0 / len(inds)

    context_labels = jnp.array([[1, 3, 0, 7, 2],
                                [0, 4, 5, 0, 9]], jnp.int32)       # (B, L)
    motif_labels = jax.random.uniform(ks[27], (B, 86), jnp.float32)

    # Inject NaNs via jnp .at[].set (the old np.asarray(...) view was read-only).
    mol_mds = jax.random.normal(ks[28], (B, 114), jnp.float32)
    mol_mds = mol_mds.at[0, 5].set(jnp.nan).at[1, 10].set(jnp.nan)

    mol_fps = (jax.random.uniform(ks[30], (B, 512)) > 0.5).astype(jnp.float32)

    batch = {
        'batch_size': B,
        'mol_dist': mol_dist,
        'scaff_dist': scaff_dist,
        'aggr2_regu': jnp.asarray(regu_np),
        'context_labels': context_labels,
        'motif_labels': motif_labels,
        'mol_mds': mol_mds,
        'mol_fps': mol_fps,
    }

    model = GNNWrapperPallas(params, emb_dim=D, num_candidates=C, margin=margin,
                             adamg_coeff=adamg_coeff, knowledge_guided=True)
    out = model.forward(graph_rep, batch)

    leaves = [v for k, v in out.items() if k != 'graph_rep']
    jax.block_until_ready(leaves)
    assert all(bool(np.all(np.isfinite(np.asarray(v)))) for v in leaves)
    print("KERNEL_OK")
</pallas_src>

<mosaic_0001>
module attributes {stable_mosaic.version = 11 : i64} {
  func.func @_cosdist_tile_kernel(%arg0: i32, %arg1: i32, %arg2: memref<8x32xf32, #tpu.memory_space<vmem>>, %arg3: memref<8x32xf32, #tpu.memory_space<vmem>>, %arg4: memref<8x8xf32, #tpu.memory_space<vmem>>) attributes {dimension_semantics = [#tpu.dimension_semantics<parallel>, #tpu.dimension_semantics<parallel>], iteration_bounds = array<i64: 1, 1>, scalar_prefetch = 0 : i64, scratch_operands = 0 : i64, tpu.core_type = #tpu.core_type<tc>, window_params = [{transform_indices = @transform_0, window_bounds = array<i64: 8, 32>}, {transform_indices = @transform_1, window_bounds = array<i64: 8, 32>}, {transform_indices = @transform_2, window_bounds = array<i64: 8, 8>}]} {
    %c0 = arith.constant 0 : index
    %c0_0 = arith.constant 0 : index
    %0 = vector.load %arg2[%c0, %c0_0] : memref<8x32xf32, #tpu.memory_space<vmem>>, vector<8x32xf32>
    %c0_1 = arith.constant 0 : index
    %c0_2 = arith.constant 0 : index
    %1 = vector.load %arg3[%c0_1, %c0_2] : memref<8x32xf32, #tpu.memory_space<vmem>>, vector<8x32xf32>
    %2 = arith.mulf %0, %0 : vector<8x32xf32>
    %cst = arith.constant dense<0.000000e+00> : vector<8xf32>
    %3 = vector.multi_reduction <add>, %2, %cst [1] : vector<8x32xf32> to vector<8xf32>
    %4 = vector.shape_cast %3 : vector<8xf32> to vector<8x1xf32>
    %cst_3 = arith.constant 1.000000e-24 : f32
    %5 = vector.broadcast %cst_3 : f32 to vector<8x1xf32>
    %6 = arith.maximumf %4, %5 : vector<8x1xf32>
    %7 = math.rsqrt %6 : vector<8x1xf32>
    %8 = arith.mulf %1, %1 : vector<8x32xf32>
    %cst_4 = arith.constant dense<0.000000e+00> : vector<8xf32>
    %9 = vector.multi_reduction <add>, %8, %cst_4 [1] : vector<8x32xf32> to vector<8xf32>
    %10 = vector.shape_cast %9 : vector<8xf32> to vector<8x1xf32>
    %cst_5 = arith.constant 1.000000e-24 : f32
    %11 = vector.broadcast %cst_5 : f32 to vector<8x1xf32>
    %12 = arith.maximumf %10, %11 : vector<8x1xf32>
    %13 = math.rsqrt %12 : vector<8x1xf32>
    %14 = vector.broadcast %7 : vector<8x1xf32> to vector<8x32xf32>
    %15 = arith.mulf %0, %14 : vector<8x32xf32>
    %16 = vector.broadcast %13 : vector<8x1xf32> to vector<8x32xf32>
    %17 = arith.mulf %1, %16 : vector<8x32xf32>
    %cst_6 = arith.constant dense<0.000000e+00> : vector<8x8xf32>
    %18 = tpu.matmul %15, %17, %cst_6 {dimension_numbers = #tpu.dot_dimension_numbers<[1], [1], [0], [0], [0, 0, 1, 0], [], []>} : vector<8x32xf32>, vector<8x32xf32>, vector<8x8xf32> -> vector<8x8xf32>
    %cst_7 = arith.constant 1.000000e+00 : f32
    %19 = vector.broadcast %cst_7 : f32 to vector<8x8xf32>
    %20 = arith.subf %19, %18 : vector<8x8xf32>
    %c0_8 = arith.constant 0 : index
    %c0_9 = arith.constant 0 : index
    %21 = vector.load %arg4[%c0_8, %c0_9] : memref<8x8xf32, #tpu.memory_space<vmem>>, vector<8x8xf32>
    tpu.vector_store %arg4[%c0_8, %c0_9], %20 {strides = array<i32>} : memref<8x8xf32, #tpu.memory_space<vmem>>, vector<8x8xf32>,
    return
  }
  func.func @transform_0(%arg0: i32, %arg1: i32) -> (i32, i32) {
    %c0_i32 = arith.constant 0 : i32
    %c0_i32_0 = arith.constant 0 : i32
    return %arg0, %c0_i32 : i32, i32
  }
  func.func @transform_1(%arg0: i32, %arg1: i32) -> (i32, i32) {
    %c0_i32 = arith.constant 0 : i32
    %c0_i32_0 = arith.constant 0 : i32
    return %arg1, %c0_i32 : i32, i32
  }
  func.func @transform_2(%arg0: i32, %arg1: i32) -> (i32, i32) {
    %c0_i32 = arith.constant 0 : i32
    return %arg0, %arg1 : i32, i32
  }
}

</mosaic_0001>

<bundles_post_ra>
// kernel: tpu_custom_call.1
= control target key start
LH: loop header
LB: loop body
LE: loop exit
PB: predicated region body
PF: predicated region fallthrough
CT: control target
= control target key end

     0   :  { %7 = vsyncpa [#allocation3], 0  ;;  %s298_s0 = inlined_call_operand.hbm [shape: f32[8,32], index: 0, kind: input, shape index: {}]   ;;  %s299_s1 = inlined_call_operand.hbm [shape: f32[8,32], index: 1, kind: input, shape index: {}]   ;;  %s300_s2 = inlined_call_operand.hbm [shape: f32[8,8], index: 2, kind: output, shape index: {}]  }
   0x1   :  { %8 = vsyncpa [#allocation6], 0 }
   0x2   :  { %9 = vsyncpa [#allocation4], 0  ;;  %s238_s9 = smov [#allocation2]   ;;  %s239_s11 = smov [#allocation5]  }
   0x3   :  { %s16_s10 = sshll.u32 %s238_s9, 4  ;;  %s26_s12 = sshll.u32 %s239_s11, 4  ;;  %s17_s10 = int_to_ptr.vmem [resolvable:$true] %s16_s10  ;;  %s27_s12 = int_to_ptr.vmem [resolvable:$true] %s26_s12 }
   0x4   :  { %s166_s15 = scalar_lea.hbm %s298_s0, 128 }
   0x5   :  { %p167_p0 = scmp.ne.s32.totalorder %s298_s0, %s166_s15  ;;  %p170_p1 = scmp.lt.u32.totalorder %s166_s15, %s298_s0 }
   0x7   :  { %p172_p2 = pnand %p170_p1, %p167_p0 }
   0x9   :  { %175 = shalt.err (!%p172_p2)
}
   0xa   :  { %s176_s20 = scalar_lea.vmem %s17_s10, 128  ;;  %p181_p4 = scmp.lt.s32.totalorder %s17_s10, %s17_s10 }
   0xb   :  { %p177_p3 = scmp.ne.s32.totalorder %s17_s10, %s176_s20  ;;  %p182_p5 = scmp.lt.s32.totalorder %s176_s20, %s176_s20 }
   0xd   :  { %p183_p6 = por %p182_p5, %p181_p4 }
   0xf   :  { %p184_p7 = pnand %p183_p6, %p177_p3 }
  0x11   :  { %187 = shalt.err (!%p184_p7)
}
  0x12   :  { %19 = dma.hbm_to_vmem [thread:$0]  %s298_s0, 128, %s17_s10, [#allocation3]  }
  0x13   :  { %s188_s25 = scalar_lea.hbm %s299_s1, 128 }
  0x14   :  { %p189_p8 = scmp.ne.s32.totalorder %s299_s1, %s188_s25  ;;  %p192_p9 = scmp.lt.u32.totalorder %s188_s25, %s299_s1 }
  0x16   :  { %p194_p10 = pnand %p192_p9, %p189_p8 }
  0x18   :  { %197 = shalt.err (!%p194_p10)
}
  0x19   :  { %s198_s30 = scalar_lea.vmem %s27_s12, 128  ;;  %p203_p12 = scmp.lt.s32.totalorder %s27_s12, %s27_s12 }
  0x1a   :  { %p199_p11 = scmp.ne.s32.totalorder %s27_s12, %s198_s30  ;;  %p204_p13 = scmp.lt.s32.totalorder %s198_s30, %s198_s30 }
  0x1c   :  { %p205_p0 = por %p204_p13, %p203_p12 }
  0x1e   :  { %p206_p1 = pnand %p205_p0, %p199_p11 }
  0x20   :  { %209 = shalt.err (!%p206_p1)
}
  0x21   :  { %29 = dma.hbm_to_vmem [thread:$0]  %s299_s1, 128, %s27_s12, [#allocation6]  }
  0x22   :  { %232 = dma.done.wait [#allocation3], 128  }
  0x23   :  { %233 = vsyncadd [#allocation3], 4294967168 }
  0x24   :  { %234 = dma.done.wait [#allocation6], 128  }
  0x25   :  { %235 = vsyncadd [#allocation6], 4294967168  ;;  %v37_v0 = vld [vmem:[#allocation5] sm:$0xff]  ;;  %vm39_vm0 = vcmask 261120   ;;  %v36_v1 = vld [vmem:[#allocation2] sm:$0xff]  ;;  %v240_v6 = vmov 0.0  }
  0x26   :  { %v45_v2 = vmul.f32 %v37_v0, %v37_v0  ;;  %v38_v3 = vmul.f32 %v36_v1, %v36_v1  ;;  %152 = vmatprep.subr.mxu0 %v240_v6  ;;  %vm241_vm1 = vmmov 0   ;;  %s242_s1 = smov [#allocation7]   ;;  %vm130_vm2 = vcmask 64512  }
  0x27   :  { %154 = vmatprep.mubr.msk.f32.mxu0 %vm241_vm1, %v240_v6  ;;  %s138_s4 = sshll.u32 %s242_s1, 4  ;;  %s139_s4 = int_to_ptr.vmem [resolvable:$true] %s138_s4 }
  0x28   :  { %v46_v4 = vsel %vm39_vm0, %v45_v2, 0.0  ;;  %v40_v5 = vsel %vm39_vm0, %v38_v3, 0.0  ;;  %s210_s5 = scalar_lea.vmem %s139_s4, 128  ;;  %p215_p3 = scmp.lt.s32.totalorder %s139_s4, %s139_s4 }
  0x29   :  { %47 = vadd.xlane.f32.xlu0 %v46_v4  ;;  %p211_p2 = scmp.ne.s32.totalorder %s139_s4, %s210_s5  ;;  %p216_p4 = scmp.lt.s32.totalorder %s210_s5, %s210_s5 }
  0x2b   :  { %p217_p5 = por %p216_p4, %p215_p3 }
  0x2d   :  { %41 = vadd.xlane.f32.xlu0 %v40_v5  ;;  %p218_p6 = pnand %p217_p5, %p211_p2 }
  0xb6   :  { %v48_v7 = vpop.xlane.xlu0 %47 }
  0xb7   :  { %v49_v8 = vmax.f32 %v48_v7, 1e-24 }
  0xb9   :  { %162 = vrsqrt.f32 %v49_v8 }
  0xba   :  { %v42_v9 = vpop.xlane.xlu0 %41 }
  0xbb   :  { %v43_v10 = vmax.f32 %v42_v9, 1e-24 }
  0xbd   :  { %164 = vrsqrt.f32 %v43_v10 }
  0xc3   :  { %v163_v11 = vpop.eup %162 }
  0xc4   :  { %v52_v12 = vmul.f32 %v163_v11, %v37_v0 }
  0xc6   :  { %153 = vmatpush3.xpose.msk.msra.mxu0 %vm39_vm0, %v52_v12 }
  0xc7   :  { %v165_v13 = vpop.eup %164 }
  0xc8   :  { %v51_v14 = vmul.f32 %v165_v13, %v36_v1 }
  0xca   :  { %155 = vmatmul.mubr.msk.f32.vlgmr.msra.gmra.mrb[0].mxu0 %vm39_vm0, %v51_v14 }
 0x19d   :  { %v125_v15 = vpop.f32.mrb[0].mxu0 }
 0x19e   :  { %v129_v16 = vsub.f32 1.0, %v125_v15  ;;  %v156_v17 = vpop.f32.mrb[1].mxu0 }
 0x1a0   :  { %131 = vst.msk [vmem:[#allocation7] sm:$0xff] %vm130_vm2, %v129_v16 }
 0x1a1   :  { %221 = shalt.err (!%p218_p6)
}
 0x1a2   :  { %s222_s8 = scalar_lea.hbm %s300_s2, 128 }
 0x1a3   :  { %p223_p7 = scmp.ne.s32.totalorder %s300_s2, %s222_s8  ;;  %p226_p8 = scmp.lt.u32.totalorder %s222_s8, %s300_s2 }
 0x1a5   :  { %p228_p9 = pnand %p226_p8, %p223_p7 }
 0x1a7   :  { %231 = shalt.err (!%p228_p9)
}
 0x1a8   :  { %141 = dma.vmem_to_hbm [thread:$0]  %s139_s4, 128, %s300_s2, [#allocation4]  }
 0x1a9   :  { %236 = dma.done.wait [#allocation4], 128  }
 0x1aa   :  { %237 = vsyncadd [#allocation4], 4294967168 }
 0x1ab   :  { %145 = vsyncpa [#allocation3], 1 }
 0x1ac   :  { %146 = vsyncpa [#allocation6], 1 }
 0x1ad   :  { %147 = vsyncpa [#allocation4], 1 }

</bundles_post_ra>
